<compile_context>
chip_gen: v7x
topology: tpu7x:2x2x1
jax: 0.10.0
libtpu: 0.0.40
codegen_flags: <defaults>
</compile_context>

<pallas_src>
import math
import functools

import numpy as np
import jax
import jax.numpy as jnp
from jax import lax
from jax.experimental import pallas as pl
from jax.experimental.pallas import tpu as pltpu

# fits v5e/v6e (128 MiB physical) and leaves headroom on v7x (64 MiB physical)
VMEM_LIMIT = 40 * 1024 * 1024


# ----------------------------------------------------------------------------
# helpers
# ----------------------------------------------------------------------------
def _ceil_to(x, m):
    return ((x + m - 1) // m) * m


def silu(x):
    return x * jax.nn.sigmoid(x)


# ----------------------------------------------------------------------------
# Pallas kernel 1: generic matmul with fused bias epilogue (bf16 MXU, f32 acc).
# K and N stay whole (small at every call site); only M is tiled.
# ----------------------------------------------------------------------------
def _mm_bias_kernel(a_ref, b_ref, bias_ref, o_ref):
    o_ref[...] = (jnp.dot(a_ref[...], b_ref[...],
                          preferred_element_type=jnp.float32)
                  + bias_ref[...])


def pallas_matmul_bias(a, b, bias=None, tm=512):
    """(M, K) @ (K, N) + bias -> f32 (M, N); operands cast to bf16 for the MXU."""
    M, K = a.shape
    K2, N = b.shape
    assert K == K2
    if bias is None:
        bias = jnp.zeros((N,), jnp.float32)
    a = a.astype(jnp.bfloat16)
    b = b.astype(jnp.bfloat16)
    bias2 = bias.astype(jnp.float32).reshape(1, N)
    tm = min(tm, M)
    Mp = _ceil_to(M, tm)
    if Mp != M:
        a = jnp.pad(a, ((0, Mp - M), (0, 0)))
    out = pl.pallas_call(
        _mm_bias_kernel,
        out_shape=jax.ShapeDtypeStruct((Mp, N), jnp.float32),
        grid=(Mp // tm,),
        in_specs=[
            pl.BlockSpec((tm, K), lambda i: (i, 0)),
            pl.BlockSpec((K, N), lambda i: (0, 0)),
            pl.BlockSpec((1, N), lambda i: (0, 0)),
        ],
        out_specs=pl.BlockSpec((tm, N), lambda i: (i, 0)),
        compiler_params=pltpu.CompilerParams(
            dimension_semantics=("parallel",),
            vmem_limit_bytes=VMEM_LIMIT),
    )(a, b, bias2)
    if Mp != M:
        out = out[:M]
    return out


# ----------------------------------------------------------------------------
# Pallas kernel 2: fused 3x3x3 conv (stride 1, pad 1), bias in the epilogue.
# Grid over output depth slices; the kernel gathers the 27 taps from a small
# VMEM depth-halo slab and accumulates 27 bf16 MXU dots -> no im2col in HBM.
# ----------------------------------------------------------------------------
def _conv3x3_kernel(x_ref, w_ref, b_ref, o_ref, *, H, W, C):
    # x_ref : (1, 3, H+2, W+2, C)  bf16   depth-halo slab for one output slice
    # w_ref : (27*C, Cout)         bf16   rows ordered ((kd*3+kh)*3+kw)*C + cin
    # b_ref : (1, Cout)            f32
    # o_ref : (1, H*W, Cout)       f32
    cout = o_ref.shape[-1]
    x = x_ref[0]                                    # (3, H+2, W+2, C)
    acc = jnp.zeros((H * W, cout), jnp.float32)
    k = 0
    for kd in range(3):
        for kh in range(3):
            row = x[kd, kh:kh + H]                  # (H, W+2, C)
            for kw in range(3):
                a = row[:, kw:kw + W, :].reshape(H * W, C)
                acc = acc + jnp.dot(a, w_ref[k * C:(k + 1) * C, :],
                                    preferred_element_type=jnp.float32)
                k += 1
    o_ref[0] = acc + b_ref[...]


def conv3d_3x3(x, w, b):
    """3x3x3 conv, stride 1, zero pad 1.  x: (B,D,H,W,Cin) f32 channels-last;
    w: (27*Cin, Cout) bf16; b: (Cout,) f32 -> (B,D,H,W,Cout) f32."""
    B, D, H, W, C = x.shape
    Cout = int(b.shape[0])

    if C < 64 or H * W < 64:
        # Tiny Cin (first layers) or tiny spatial tiles (deep levels): the
        # 27x im2col is only a few KB, so build it in XLA and reuse the single
        # generic matmul kernel (fewer distinct Mosaic compiles, same math).
        xp = jnp.pad(x, ((0, 0), (1, 1), (1, 1), (1, 1), (0, 0)))
        cols = [xp[:, kd:kd + D, kh:kh + H, kw:kw + W, :]
                for kd in range(3) for kh in range(3) for kw in range(3)]
        col = jnp.concatenate(cols, axis=-1).reshape(B * D * H * W, 27 * C)
        out = pallas_matmul_bias(col, w, b)
        return out.reshape(B, D, H, W, Cout)

    Hp, Wp = H + 2, W + 2
    xp = jnp.pad(x.astype(jnp.bfloat16),
                 ((0, 0), (1, 1), (1, 1), (1, 1), (0, 0)))
    # TODO(synk): depth halo is provided via a 3x slab stack (cheap vs 27x
    # im2col); a manual halo DMA with memory_space=pl.ANY would remove it.
    slabs = jnp.stack([xp[:, kd:kd + D] for kd in range(3)], axis=2)
    slabs = slabs.reshape(B * D, 3, Hp, Wp, C)

    out = pl.pallas_call(
        functools.partial(_conv3x3_kernel, H=H, W=W, C=C),
        out_shape=jax.ShapeDtypeStruct((B * D, H * W, Cout), jnp.float32),
        grid=(B * D,),
        in_specs=[
            pl.BlockSpec((1, 3, Hp, Wp, C), lambda i: (i, 0, 0, 0, 0)),
            pl.BlockSpec((27 * C, Cout), lambda i: (0, 0)),
            pl.BlockSpec((1, Cout), lambda i: (0, 0)),
        ],
        out_specs=pl.BlockSpec((1, H * W, Cout), lambda i: (i, 0, 0)),
        compiler_params=pltpu.CompilerParams(
            dimension_semantics=("parallel",),
            vmem_limit_bytes=VMEM_LIMIT),
    )(slabs, w.astype(jnp.bfloat16), b.astype(jnp.float32).reshape(1, Cout))
    return out.reshape(B, D, H, W, Cout)


def conv3d_1x1(x, w, b):
    B, D, H, W, C = x.shape
    out = pallas_matmul_bias(x.reshape(-1, C), w, b)
    return out.reshape(B, D, H, W, -1)


def conv_transpose3d_2x2(x, w, b):
    """ConvTranspose3d kernel=2, stride=2 (MONAI 'deconv' upsample).
    x: (B,D,H,W,Cin) -> (B,2D,2H,2W,Cout); w: (Cin, 8*Cout) bf16 with columns
    ordered (kd, kh, kw, cout)."""
    B, D, H, W, C = x.shape
    Cout = int(b.shape[0])
    bias8 = jnp.tile(b.astype(jnp.float32), 8)          # matches column order
    y = pallas_matmul_bias(x.reshape(-1, C), w, bias8)  # (B*D*H*W, 8*Cout)
    y = y.reshape(B, D, H, W, 2, 2, 2, Cout)
    # TODO(synk): the (2,2,2) pixel-shuffle scatter stays in XLA; it is a tiny
    # relayout at these sizes and has no clean BlockSpec scatter expression.
    y = jnp.transpose(y, (0, 1, 4, 2, 5, 3, 6, 7)).reshape(
        B, 2 * D, 2 * H, 2 * W, Cout)
    return y


def max_pool3d_2(x):
    # TODO(synk): 2x2x2 max-pool stays in XLA (pure relayout+max, mem-bound).
    B, D, H, W, C = x.shape
    return x.reshape(B, D // 2, 2, H // 2, 2, W // 2, 2, C).max(axis=(2, 4, 6))


# ----------------------------------------------------------------------------
# Pallas kernel 3: channels-last InstanceNorm3d + LeakyReLU(0.1)
#                  (+ optional fused per-channel time-embedding add)
# operates directly on (B, S, C); no HBM transposes.
# ----------------------------------------------------------------------------
def _inorm_lrelu_kernel(x_ref, g_ref, b_ref, a_ref, o_ref, *, eps, slope):
    x = x_ref[0]                                        # (S, C) f32
    mean = jnp.mean(x, axis=0, keepdims=True)           # (1, C)
    xc = x - mean
    var = jnp.mean(xc * xc, axis=0, keepdims=True)      # biased var (PyTorch IN)
    y = xc * lax.rsqrt(var + eps) * g_ref[...] + b_ref[...]
    y = jnp.where(y >= 0.0, y, slope * y)
    o_ref[0] = y + a_ref[...]                           # fused emb add (or zeros)


def instance_norm_lrelu(x, gamma, beta, add=None, *, eps=1e-5, slope=0.1):
    """x: (B, D, H, W, C) f32 -> same shape.  `add`: optional (B, C) added
    after the activation (Diff-UNet time-embedding broadcast)."""
    B, D, H, W, C = x.shape
    S = D * H * W
    xr = x.reshape(B, S, C).astype(jnp.float32)
    if add is None:
        add = jnp.zeros((B, C), jnp.float32)
    out = pl.pallas_call(
        functools.partial(_inorm_lrelu_kernel, eps=eps, slope=slope),
        out_shape=jax.ShapeDtypeStruct((B, S, C), jnp.float32),
        grid=(B,),
        in_specs=[
            pl.BlockSpec((1, S, C), lambda b: (b, 0, 0)),
            pl.BlockSpec((1, C), lambda b: (0, 0)),
            pl.BlockSpec((1, C), lambda b: (0, 0)),
            pl.BlockSpec((1, C), lambda b: (b, 0)),
        ],
        out_specs=pl.BlockSpec((1, S, C), lambda b: (b, 0, 0)),
        compiler_params=pltpu.CompilerParams(
            dimension_semantics=("parallel",),
            vmem_limit_bytes=VMEM_LIMIT),
    )(xr, gamma.astype(jnp.float32).reshape(1, C),
      beta.astype(jnp.float32).reshape(1, C), add.astype(jnp.float32))
    return out.reshape(B, D, H, W, C)


# ----------------------------------------------------------------------------
# Pallas kernel 4: diffusion q_sample  (sqrt(acp_t)*x + sqrt(1-acp_t)*noise)
# lane-dense (1, N/128, 128) blocks, per-batch scalars in SMEM, batch parallel.
# ----------------------------------------------------------------------------
def _qsample_kernel(sa_ref, sb_ref, x_ref, n_ref, o_ref):
    b = pl.program_id(0)
    o_ref[...] = sa_ref[b] * x_ref[...] + sb_ref[b] * n_ref[...]


def pallas_q_sample(x, noise, sqrt_acp_t, sqrt_1macp_t):
    B = x.shape[0]
    n = int(np.prod(x.shape[1:]))
    L = 128
    npad = _ceil_to(n, L)
    xf = x.reshape(B, n).astype(jnp.float32)
    nf = noise.reshape(B, n).astype(jnp.float32)
    if npad != n:
        xf = jnp.pad(xf, ((0, 0), (0, npad - n)))
        nf = jnp.pad(nf, ((0, 0), (0, npad - n)))
    R = npad // L
    xf = xf.reshape(B, R, L)
    nf = nf.reshape(B, R, L)
    out = pl.pallas_call(
        _qsample_kernel,
        out_shape=jax.ShapeDtypeStruct((B, R, L), jnp.float32),
        grid=(B,),
        in_specs=[
            pl.BlockSpec(memory_space=pltpu.MemorySpace.SMEM),
            pl.BlockSpec(memory_space=pltpu.MemorySpace.SMEM),
            pl.BlockSpec((1, R, L), lambda b: (b, 0, 0)),
            pl.BlockSpec((1, R, L), lambda b: (b, 0, 0)),
        ],
        out_specs=pl.BlockSpec((1, R, L), lambda b: (b, 0, 0)),
        compiler_params=pltpu.CompilerParams(
            dimension_semantics=("parallel",)),
    )(sqrt_acp_t.astype(jnp.float32), sqrt_1macp_t.astype(jnp.float32), xf, nf)
    out = out.reshape(B, npad)[:, :n]
    return out.reshape(x.shape)


# ----------------------------------------------------------------------------
# MONAI-style TwoConv / Down / UpCat (with Diff-UNet time-embedding add)
# ----------------------------------------------------------------------------
def timestep_embedding(t, dim=128, max_period=10000):
    half = dim // 2
    freqs = jnp.exp(-math.log(max_period) *
                    jnp.arange(half, dtype=jnp.float32) / half)
    args = t.astype(jnp.float32)[:, None] * freqs[None, :]
    return jnp.concatenate([jnp.cos(args), jnp.sin(args)], axis=-1)


def two_conv(x, p, temb=None):
    h = conv3d_3x3(x, p['w0'], p['b0'])
    add = None
    if temb is not None:                              # emb_layers: SiLU + Linear
        add = pallas_matmul_bias(silu(temb), p['emb_w'], p['emb_b'])   # (B, C)
    h = instance_norm_lrelu(h, p['g0'], p['bt0'], add=add)
    h = conv3d_3x3(h, p['w1'], p['b1'])
    h = instance_norm_lrelu(h, p['g1'], p['bt1'])
    return h


def up_cat(x, x_e, p, temb):
    up = conv_transpose3d_2x2(x, p['up_w'], p['up_b'])
    h = jnp.concatenate([x_e, up], axis=-1)           # MONAI cat order [x_e, up]
    return two_conv(h, p['tc'], temb)


# ----------------------------------------------------------------------------
# Parameter init (deterministic, synthetic).  MXU weights stored in bf16.
# ----------------------------------------------------------------------------
FEATURES = (64, 64, 128, 256, 512, 64)
TIME_DIM = 512


def _conv3_w(key, cin, cout):
    w = jax.random.normal(key, (27 * cin, cout), jnp.float32) / math.sqrt(27 * cin)
    return w.astype(jnp.bfloat16)


def _lin_w(key, cin, cout):
    w = jax.random.normal(key, (cin, cout), jnp.float32) / math.sqrt(cin)
    return w.astype(jnp.bfloat16)


def init_two_conv(key, cin, cout, with_temb):
    ks = jax.random.split(key, 3)
    p = {
        'w0': _conv3_w(ks[0], cin, cout), 'b0': jnp.zeros((cout,), jnp.float32),
        'g0': jnp.ones((cout,), jnp.float32), 'bt0': jnp.zeros((cout,), jnp.float32),
        'w1': _conv3_w(ks[1], cout, cout), 'b1': jnp.zeros((cout,), jnp.float32),
        'g1': jnp.ones((cout,), jnp.float32), 'bt1': jnp.zeros((cout,), jnp.float32),
    }
    if with_temb:
        p['emb_w'] = _lin_w(ks[2], TIME_DIM, cout)
        p['emb_b'] = jnp.zeros((cout,), jnp.float32)
    return p


def init_encoder(key, img_ch):
    f = FEATURES
    ks = jax.random.split(key, 5)
    return {
        'conv0': init_two_conv(ks[0], img_ch, f[0], False),
        'down1': init_two_conv(ks[1], f[0], f[1], False),
        'down2': init_two_conv(ks[2], f[1], f[2], False),
        'down3': init_two_conv(ks[3], f[2], f[3], False),
        'down4': init_two_conv(ks[4], f[3], f[4], False),
    }


def init_decoder(key, in_ch, out_ch):
    f = FEATURES
    ks = jax.random.split(key, 12)

    def upcat_params(k, cin_up, cup, ccat, cout):
        k1, k2 = jax.random.split(k)
        return {
            'up_w': (jax.random.normal(k1, (cin_up, 8 * cup), jnp.float32)
                     / math.sqrt(cin_up)).astype(jnp.bfloat16),
            'up_b': jnp.zeros((cup,), jnp.float32),
            'tc': init_two_conv(k2, ccat + cup, cout, True),
        }

    return {
        'te_w0': _lin_w(ks[0], 128, TIME_DIM), 'te_b0': jnp.zeros((TIME_DIM,), jnp.float32),
        'te_w1': _lin_w(ks[1], TIME_DIM, TIME_DIM), 'te_b1': jnp.zeros((TIME_DIM,), jnp.float32),
        'conv0': init_two_conv(ks[2], in_ch, f[0], True),
        'down1': init_two_conv(ks[3], f[0], f[1], True),
        'down2': init_two_conv(ks[4], f[1], f[2], True),
        'down3': init_two_conv(ks[5], f[2], f[3], True),
        'down4': init_two_conv(ks[6], f[3], f[4], True),
        'up4': upcat_params(ks[7], f[4], f[4] // 2, f[3], f[3]),
        'up3': upcat_params(ks[8], f[3], f[3] // 2, f[2], f[2]),
        'up2': upcat_params(ks[9], f[2], f[2] // 2, f[1], f[1]),
        'up1': upcat_params(ks[10], f[1], f[1], f[0], f[5]),   # halves=False
        'final_w': _lin_w(ks[11], f[5], out_ch),
        'final_b': jnp.zeros((out_ch,), jnp.float32),
    }


# ----------------------------------------------------------------------------
# BasicUNetEncoder / BasicUNetDe forward passes (channels-last)
# ----------------------------------------------------------------------------
def encoder_forward(p, image):
    x0 = two_conv(image, p['conv0'])
    x1 = two_conv(max_pool3d_2(x0), p['down1'])
    x2 = two_conv(max_pool3d_2(x1), p['down2'])
    x3 = two_conv(max_pool3d_2(x2), p['down3'])
    x4 = two_conv(max_pool3d_2(x3), p['down4'])
    return [x0, x1, x2, x3, x4]


def decoder_forward(p, x, t, image, embeddings):
    temb = pallas_matmul_bias(timestep_embedding(t, 128), p['te_w0'], p['te_b0'])
    temb = pallas_matmul_bias(silu(temb), p['te_w1'], p['te_b1'])
    h = jnp.concatenate([image, x], axis=-1)            # torch.cat([image, x], 1)
    x0 = two_conv(h, p['conv0'], temb) + embeddings[0]
    x1 = two_conv(max_pool3d_2(x0), p['down1'], temb) + embeddings[1]
    x2 = two_conv(max_pool3d_2(x1), p['down2'], temb) + embeddings[2]
    x3 = two_conv(max_pool3d_2(x2), p['down3'], temb) + embeddings[3]
    x4 = two_conv(max_pool3d_2(x3), p['down4'], temb) + embeddings[4]
    u4 = up_cat(x4, x3, p['up4'], temb)
    u3 = up_cat(u4, x2, p['up3'], temb)
    u2 = up_cat(u3, x1, p['up2'], temb)
    u1 = up_cat(u2, x0, p['up1'], temb)
    return conv3d_1x1(u1, p['final_w'], p['final_b'])


# ----------------------------------------------------------------------------
# Diffusion schedules (guided_diffusion semantics)
# ----------------------------------------------------------------------------
def get_linear_betas(T=1000):
    scale = 1000.0 / T
    return np.linspace(scale * 1e-4, scale * 0.02, T, dtype=np.float64)


def space_timesteps(T, section_counts):
    size_per = T // len(section_counts)
    extra = T % len(section_counts)
    start, all_steps = 0, []
    for i, count in enumerate(section_counts):
        size = size_per + (1 if i < extra else 0)
        frac_stride = 1 if count <= 1 else (size - 1) / (count - 1)
        cur = 0.0
        for _ in range(count):
            all_steps.append(start + round(cur))
            cur += frac_stride
        start += size
    return sorted(set(all_steps))


# ----------------------------------------------------------------------------
# DiffUNet
# ----------------------------------------------------------------------------
class DiffUNetPallas:
    def __init__(self, in_channels, out_channels, patch_size, key):
        self.in_channels = in_channels
        self.out_channels = out_channels
        self.patch_size = patch_size
        k_enc, k_dec = jax.random.split(key)
        self.enc_params = init_encoder(k_enc, in_channels)
        self.dec_params = init_decoder(k_dec, in_channels + out_channels,
                                       out_channels)

        betas = get_linear_betas(1000)
        acp = np.cumprod(1.0 - betas)
        # training diffusion: SpacedDiffusion keeping all 1000 timesteps
        self.sqrt_acp = jnp.asarray(np.sqrt(acp), jnp.float32)
        self.sqrt_1macp = jnp.asarray(np.sqrt(1.0 - acp), jnp.float32)
        # sampling diffusion: 10 respaced timesteps (space_timesteps(1000,[10]))
        ts_map = space_timesteps(1000, [10])
        acp_s = acp[np.asarray(ts_map)]
        self.ddim_t_map = jnp.asarray(ts_map, jnp.int32)
        self.ddim_acp = jnp.asarray(acp_s, jnp.float32)
        self.ddim_acp_prev = jnp.asarray(np.append(1.0, acp_s[:-1]), jnp.float32)

    # inputs / outputs are PyTorch-style NCDHW
    def forward(self, image=None, x=None, pred_type=None, step=None, key=None):
        if pred_type == "q_sample":
            B = x.shape[0]
            kt, kn = jax.random.split(key)
            noise = jax.random.normal(kn, x.shape, jnp.float32)
            t = jax.random.randint(kt, (B,), 0, 1000)       # UniformSampler
            out = pallas_q_sample(x, noise, self.sqrt_acp[t], self.sqrt_1macp[t])
            return out, t, noise

        elif pred_type == "denoise":
            image_cl = jnp.transpose(image, (0, 2, 3, 4, 1))
            x_cl = jnp.transpose(x, (0, 2, 3, 4, 1))
            emb = encoder_forward(self.enc_params, image_cl)
            logits = decoder_forward(self.dec_params, x_cl, step, image_cl, emb)
            return jnp.transpose(logits, (0, 4, 1, 2, 3))

        elif pred_type == "ddim_sample":
            image_cl = jnp.transpose(image, (0, 2, 3, 4, 1))
            emb = encoder_forward(self.enc_params, image_cl)
            D_, H_, W_ = self.patch_size
            x_init = jax.random.normal(key, (1, D_, H_, W_, self.out_channels),
                                       jnp.float32)
            n_steps = self.ddim_t_map.shape[0]

            def body(i, carry):
                xc, _ = carry
                ti = n_steps - 1 - i
                t_orig = self.ddim_t_map[ti] * jnp.ones((1,), jnp.int32)
                model_out = decoder_forward(self.dec_params, xc, t_orig,
                                            image_cl, emb)
                pred_xstart = jnp.clip(model_out, -1.0, 1.0)   # clip_denoised
                acp_t = self.ddim_acp[ti]
                acp_prev = self.ddim_acp_prev[ti]
                eps = (jnp.sqrt(1.0 / acp_t) * xc - pred_xstart) \
                      / jnp.sqrt(1.0 / acp_t - 1.0)
                mean_pred = pred_xstart * jnp.sqrt(acp_prev) \
                            + jnp.sqrt(1.0 - acp_prev) * eps   # eta = 0 -> no noise
                return (mean_pred, pred_xstart)

            _, pred = lax.fori_loop(0, n_steps, body,
                                    (x_init, jnp.zeros_like(x_init)))
            return jnp.transpose(pred, (0, 4, 1, 2, 3))
        # TODO(synk): training-loss branches of SpacedDiffusion (LossType.MSE)
        # are not part of this forward and are not implemented.


# ----------------------------------------------------------------------------
# Demo
# ----------------------------------------------------------------------------
if __name__ == "__main__":
    key = jax.random.PRNGKey(0)
    k_params, k_img, k_x, k_seg = jax.random.split(key, 4)

    in_channels, out_channels = 1, 2
    patch_size = (16, 16, 16)   # 4 downsamples -> deepest spatial 1^3
    model = DiffUNetPallas(in_channels, out_channels, patch_size, k_params)

    # ---- pred_type == "q_sample" (batch 2) ----
    x_seg = jax.random.normal(k_seg, (2, out_channels) + patch_size, jnp.float32)
    q_fn = jax.jit(lambda xx, kk: model.forward(x=xx, pred_type="q_sample", key=kk))
    x_t, t, noise = q_fn(x_seg, jax.random.PRNGKey(1))
    jax.block_until_ready(x_t)
    assert x_t.shape == x_seg.shape and t.shape == (2,)
    assert bool(jnp.all(jnp.isfinite(x_t)))

    # ---- pred_type == "denoise" (batch 1) ----
    image = jax.random.normal(k_img, (1, in_channels) + patch_size, jnp.float32)
    x_noisy = jax.random.normal(k_x, (1, out_channels) + patch_size, jnp.float32)
    step = jnp.array([500], jnp.int32)
    den_fn = jax.jit(lambda im, xx, st: model.forward(image=im, x=xx,
                                                      pred_type="denoise", step=st))
    logits = den_fn(image, x_noisy, step)
    jax.block_until_ready(logits)
    assert logits.shape == (1, out_channels) + patch_size
    assert bool(jnp.all(jnp.isfinite(logits)))

    # pred_type == "ddim_sample" is implemented above (10 respaced DDIM steps,
    # i.e. 10 full decoder passes reusing the same Pallas kernels exercised by
    # "denoise"); it is intentionally not executed here to keep the demo fast.

    print("KERNEL_OK")
</pallas_src>

<mosaic_0001>
module attributes {stable_mosaic.version = 11 : i64} {
  func.func @_qsample_kernel(%arg0: i32, %arg1: memref<2xf32, #tpu.memory_space<smem>>, %arg2: memref<2xf32, #tpu.memory_space<smem>>, %arg3: memref<1x64x128xf32, #tpu.memory_space<vmem>>, %arg4: memref<1x64x128xf32, #tpu.memory_space<vmem>>, %arg5: memref<1x64x128xf32, #tpu.memory_space<vmem>>) attributes {dimension_semantics = [#tpu.dimension_semantics<parallel>], iteration_bounds = array<i64: 2>, scalar_prefetch = 0 : i64, scratch_operands = 0 : i64, tpu.core_type = #tpu.core_type<tc>, window_params = [{transform_indices = @transform_0, window_bounds = array<i64: 2>}, {transform_indices = @transform_1, window_bounds = array<i64: 2>}, {transform_indices = @transform_2, window_bounds = array<i64: 1, 64, 128>}, {transform_indices = @transform_3, window_bounds = array<i64: 1, 64, 128>}, {transform_indices = @transform_4, window_bounds = array<i64: 1, 64, 128>}]} {
    %0 = arith.index_cast %arg0 : i32 to index
    %1 = memref.load %arg1[%0] : memref<2xf32, #tpu.memory_space<smem>>
    %c0 = arith.constant 0 : index
    %c0_0 = arith.constant 0 : index
    %c0_1 = arith.constant 0 : index
    %2 = vector.load %arg3[%c0, %c0_0, %c0_1] : memref<1x64x128xf32, #tpu.memory_space<vmem>>, vector<1x64x128xf32>
    %3 = vector.broadcast %1 : f32 to vector<1x64x128xf32>
    %4 = arith.mulf %3, %2 : vector<1x64x128xf32>
    %5 = arith.index_cast %arg0 : i32 to index
    %6 = memref.load %arg2[%5] : memref<2xf32, #tpu.memory_space<smem>>
    %c0_2 = arith.constant 0 : index
    %c0_3 = arith.constant 0 : index
    %c0_4 = arith.constant 0 : index
    %7 = vector.load %arg4[%c0_2, %c0_3, %c0_4] : memref<1x64x128xf32, #tpu.memory_space<vmem>>, vector<1x64x128xf32>
    %8 = vector.broadcast %6 : f32 to vector<1x64x128xf32>
    %9 = arith.mulf %8, %7 : vector<1x64x128xf32>
    %10 = arith.addf %4, %9 : vector<1x64x128xf32>
    %c0_5 = arith.constant 0 : index
    %c0_6 = arith.constant 0 : index
    %c0_7 = arith.constant 0 : index
    %11 = vector.load %arg5[%c0_5, %c0_6, %c0_7] : memref<1x64x128xf32, #tpu.memory_space<vmem>>, vector<1x64x128xf32>
    tpu.vector_store %arg5[%c0_5, %c0_6, %c0_7], %10 {strides = array<i32>} : memref<1x64x128xf32, #tpu.memory_space<vmem>>, vector<1x64x128xf32>,
    return
  }
  func.func @transform_0(%arg0: i32) -> i32 {
    %c0_i32 = arith.constant 0 : i32
    %c0_i32_0 = arith.constant 0 : i32
    return %c0_i32 : i32
  }
  func.func @transform_1(%arg0: i32) -> i32 {
    %c0_i32 = arith.constant 0 : i32
    %c0_i32_0 = arith.constant 0 : i32
    return %c0_i32 : i32
  }
  func.func @transform_2(%arg0: i32) -> (i32, i32, i32) {
    %c0_i32 = arith.constant 0 : i32
    %c0_i32_0 = arith.constant 0 : i32
    %c0_i32_1 = arith.constant 0 : i32
    return %arg0, %c0_i32, %c0_i32_0 : i32, i32, i32
  }
  func.func @transform_3(%arg0: i32) -> (i32, i32, i32) {
    %c0_i32 = arith.constant 0 : i32
    %c0_i32_0 = arith.constant 0 : i32
    %c0_i32_1 = arith.constant 0 : i32
    return %arg0, %c0_i32, %c0_i32_0 : i32, i32, i32
  }
  func.func @transform_4(%arg0: i32) -> (i32, i32, i32) {
    %c0_i32 = arith.constant 0 : i32
    %c0_i32_0 = arith.constant 0 : i32
    %c0_i32_1 = arith.constant 0 : i32
    return %arg0, %c0_i32, %c0_i32_0 : i32, i32, i32
  }
}

</mosaic_0001>

<bundles_post_ra>
// kernel: _lambda_.1
= control target key start
LH: loop header
LB: loop body
LE: loop exit
PB: predicated region body
PF: predicated region fallthrough
CT: control target
= control target key end

     0   :  { %9 = vsyncpa [#allocation3], 0  ;;  %s599_s0 = inlined_call_operand.vmem [shape: f32[2], index: 0, kind: input, shape index: {}]   ;;  %s600_s1 = inlined_call_operand.vmem [shape: f32[2], index: 1, kind: input, shape index: {}]   ;;  %s601_s2 = inlined_call_operand.vmem [shape: f32[2,64,128], index: 2, kind: input, shape index: {}]   ;;  %s602_s3 = inlined_call_operand.vmem [shape: f32[2,64,128], index: 3, kind: input, shape index: {}]   ;;  %s603_s4 = inlined_call_operand.vmem [shape: f32[2,64,128], index: 4, kind: output, shape index: {}]  }
   0x1   :  { %10 = vsyncpa [#allocation5], 0  ;;  %s508_s15 = smov 0  }
   0x2 LB: > { %s514_s16 = sadd.s32 4294967295, %s479_s15   ;;  %p388_p0 = scmp.ge.s32.totalorder %s479_s15, 1  ;;  %s479_s15 = sphi %s508_s15, %s16_s15  }
   0x3   : > { %p141_p1 = scmp.lt.s32.totalorder %s479_s15, 3  ;;  %s154_s19 = sshll.u32 %s599_s0, 4  ;;  %s155_s19 = int_to_ptr.vmem [resolvable:$true] %s154_s19 }
   0x4   : > { %p604_p3 = scmp.eq.s32.totalorder %s514_s16, 0  ;;  %s165_s23 = sshll.u32 %s600_s1, 4  ;;  %s166_s23 = int_to_ptr.vmem [resolvable:$true] %s165_s23 }
   0x5   : > { %p521_p2 = pnand %p388_p0, %p141_p1  ;;  %s435_s25 = scalar_lea.vmem %s155_s19, 16 }
   0x6   : > { %p436_p6 = scmp.ne.s32.totalorder %s155_s19, %s435_s25  ;;  %p443_p10 = scmp.lt.s32.totalorder %s155_s19, %s155_s19 }
   0x7   : > { %s606_s20 = scalar_select %p521_p2, 1, 0 }
   0x8   : > { %p414_p4 = pneg %p521_p2  ;;  %p444_p11 = scmp.lt.s32.totalorder %s435_s25, %s435_s25 }
   0xa   : > { %p533_p5 = pnand %p604_p3, %p414_p4  ;;  %p445_p12 = por %p444_p11, %p443_p10 }
   0xc   : > { %p437_p7 = pneg %p533_p5 }
   0xe   : > { %p438_p8 = pnand %p437_p7, %p436_p6 }
  0x10   : > { %p439_p9 = pneg %p438_p8 }
  0x12   : > { %p446_p13 = pnand %p445_p12, %p439_p9 }
  0x14   : > { %449 = shalt.err (!%p446_p13)
}
  0x15   : > { %s481_s26 = smov [#allocation2]   ;;  %s450_s27 = scalar_lea.vmem %s166_s23, 16 }
  0x16   : > { %417 = dma.vmem_to_smem (!%p533_p5), %s155_s19, 16, %s481_s26, [#allocation3]  }
  0x17   : > { %p451_p0 = scmp.ne.s32.totalorder %s166_s23, %s450_s27  ;;  %p458_p3 = scmp.lt.s32.totalorder %s166_s23, %s166_s23 }
  0x18   : > { %p459_p2 = scmp.lt.s32.totalorder %s450_s27, %s450_s27 }
  0x19   : > { %p453_p1 = pnand %p451_p0, %p437_p7 }
  0x1a   : > { %p460_p6 = por %p459_p2, %p458_p3 }
  0x1b   : > { %p454_p4 = pneg %p453_p1 }
  0x1d   : > { %p461_p8 = pnand %p460_p6, %p454_p4 }
  0x1f   : > { %464 = shalt.err (!%p461_p8)
}
  0x20   : > { %s482_s28 = smov [#allocation4]   ;;  %p608_p9 = scmp.ne.s32.totalorder %s606_s20, 0 }
  0x21   : > { %420 = dma.vmem_to_smem (!%p533_p5), %s166_s23, 16, %s482_s28, [#allocation5]  }
  0x22   : > { %194 = sbr.rel (%p608_p9) target bundleno = 65 (0x41), region = 36  ;;  %p609_p10 = scmp.eq.s32.totalorder (!%p608_p9), %s514_s16, 0 }
  0x29   : > { %470 = dma.done.wait (%p609_p10), [#allocation3], 16   ;;  %p610_p11 = pmov %p609_p10 }
  0x2a   : > { %p611_p7 = pmov %p609_p10 }
  0x2b   : > { %472 = vsyncadd (%p610_p11), [#allocation3], 4294967280 }
  0x2c   : > { %474 = dma.done.wait (%p611_p7), [#allocation5], 16   ;;  %p612_p2 = pmov %p611_p7 }
  0x2e   : > { %476 = vsyncadd (%p612_p2), [#allocation5], 4294967280 }
  0x2f   : > { %204 = sfence }
  0x30   : > { %p230_p3 = scmp.lt.s32.totalorder %s514_s16, 1  ;;  %s245_s29 = sld [smem:[#allocation2 + %s514_s16]] }
  0x31   : > { %s263_s30 = sld [smem:[#allocation4 + %s514_s16]] }
  0x32   : > { %s614_s16 = smov (!%p230_p3, %s514_s16), 1 }
  0x33   : > { %s403_s5 = sshll.u32 %s614_s16, 6 }
  0x34   : > { %s560_s8 = scalar_lea.vmem %s601_s2, %s403_s5  ;;  %s565_s11 = scalar_lea.vmem %s602_s3, %s403_s5 }
  0x35   : > { %v246_v0 = vld [vmem:[%s560_s8] sm:$0xff]  ;;  %v247_v3 = vld [vmem:[%s560_s8 + $0x8] sm:$0xff]  ;;  %v248_v8 = vld [vmem:[%s560_s8 + $0x10] sm:$0xff]  ;;  %s579_s14 = scalar_lea.vmem %s603_s4, %s403_s5 }
  0x36   : > { %v254_v1 = vstv %s245_s29  ;;  %v264_v2 = vld [vmem:[%s565_s11] sm:$0xff]  ;;  %v265_v7 = vld [vmem:[%s565_s11 + $0x8] sm:$0xff]  ;;  %v266_v9 = vld [vmem:[%s565_s11 + $0x10] sm:$0xff] }
  0x37   : > { %v255_v4 = vmul.f32 %v254_v1, %v246_v0  ;;  %v272_v5 = vstv %s263_s30  ;;  %v256_v6 = vmul.f32 %v254_v1, %v247_v3  ;;  %v257_v12 = vmul.f32 %v254_v1, %v248_v8  ;;  %v249_v14 = vld [vmem:[%s560_s8 + $0x18] sm:$0xff]  ;;  %v250_v16 = vld [vmem:[%s560_s8 + $0x20] sm:$0xff]  ;;  %v251_v21 = vld [vmem:[%s560_s8 + $0x28] sm:$0xff] }
  0x38   : > { %v273_v10 = vmul.f32 %v272_v5, %v264_v2  ;;  %v274_v11 = vmul.f32 %v272_v5, %v265_v7  ;;  %v275_v13 = vmul.f32 %v272_v5, %v266_v9  ;;  %v267_v15 = vld [vmem:[%s565_s11 + $0x18] sm:$0xff]  ;;  %v258_v17 = vmul.f32 %v254_v1, %v249_v14  ;;  %v268_v20 = vld [vmem:[%s565_s11 + $0x20] sm:$0xff]  ;;  %v269_v22 = vld [vmem:[%s565_s11 + $0x28] sm:$0xff] }
  0x39   : > { %v276_v18 = vmul.f32 %v272_v5, %v267_v15  ;;  %v259_v19 = vmul.f32 %v254_v1, %v250_v16  ;;  %v277_v26 = vmul.f32 %v272_v5, %v268_v20  ;;  %v252_v27 = vld [vmem:[%s560_s8 + $0x30] sm:$0xff]  ;;  %v253_v29 = vld [vmem:[%s560_s8 + $0x38] sm:$0xff]  ;;  %v260_v31 = vmul.f32 %v254_v1, %v251_v21 }
  0x3a   : > { %v281_v23 = vadd.f32 %v273_v10, %v255_v4  ;;  %v282_v24 = vadd.f32 %v274_v11, %v256_v6  ;;  %v283_v25 = vadd.f32 %v275_v13, %v257_v12  ;;  %v270_v28 = vld [vmem:[%s565_s11 + $0x30] sm:$0xff]  ;;  %v278_v32 = vmul.f32 %v272_v5, %v269_v22  ;;  %v271_v34 = vld [vmem:[%s565_s11 + $0x38] sm:$0xff] }
  0x3b   : > { %v284_v30 = vadd.f32 %v276_v18, %v258_v17  ;;  %v261_v33 = vmul.f32 %v254_v1, %v252_v27  ;;  %v285_v35 = vadd.f32 %v277_v26, %v259_v19  ;;  %v279_v36 = vmul.f32 %v272_v5, %v270_v28 }
  0x3c   : > { %289 = vst [vmem:[%s579_s14] sm:$0xff] %v281_v23  ;;  %290 = vst [vmem:[%s579_s14 + $0x8] sm:$0xff] %v282_v24  ;;  %v262_v37 = vmul.f32 %v254_v1, %v253_v29  ;;  %v280_v38 = vmul.f32 %v272_v5, %v271_v34  ;;  %v286_v39 = vadd.f32 %v278_v32, %v260_v31 }
  0x3d   : > { %291 = vst [vmem:[%s579_s14 + $0x10] sm:$0xff] %v283_v25  ;;  %292 = vst [vmem:[%s579_s14 + $0x18] sm:$0xff] %v284_v30  ;;  %v287_v40 = vadd.f32 %v279_v36, %v261_v33 }
  0x3e   : > { %293 = vst [vmem:[%s579_s14 + $0x20] sm:$0xff] %v285_v35  ;;  %v288_v41 = vadd.f32 %v280_v38, %v262_v37  ;;  %294 = vst [vmem:[%s579_s14 + $0x28] sm:$0xff] %v286_v39 }
  0x3f   : > { %295 = vst [vmem:[%s579_s14 + $0x30] sm:$0xff] %v287_v40 }
  0x40   : > { %296 = vst [vmem:[%s579_s14 + $0x38] sm:$0xff] %v288_v41 }
  0x41 PF: > { %s16_s15 = sadd.s32 1, %s479_s15  }
  0x42   : > { %p13_p5 = scmp.ge.s32.totalorder %s16_s15, 4  }
  0x44   :  { %15 = sbr.rel (!%p13_p5) target bundleno = 2 (0x2), region = 78 }
  0x4b   :  { %318 = vsyncpa [#allocation3], 1 }
  0x4c   :  { %320 = vsyncpa [#allocation3 + $0x1], 1 }
  0x4d   :  { %321 = vsyncpa [#allocation5], 1 }

</bundles_post_ra>
